<compile_context>
chip_gen: v6e
topology: v6e:2x2x1
jax: 0.10.0
libtpu: 0.0.40
codegen_flags: <defaults>
</compile_context>

<pallas_src>
import jax
import jax.numpy as jnp
from jax.experimental import pallas as pl
from jax.experimental.pallas import tpu as pltpu

EPS = 1e-4  # The module explicitly sets BatchNorm2d(eps=0.0001) (not the 1e-5 default).


def _stats_kernel(w_ref, xcol_ref, sum_ref, sq_ref):
    """Pass 1: per-tile per-channel partial sum and sum-of-squares."""
    # MXU matmul, bf16 inputs, f32 accumulation.  y: (Cout, TM), M on lanes.
    y = jnp.dot(w_ref[...], xcol_ref[...], preferred_element_type=jnp.float32)
    sum_ref[0, :, :] = jnp.sum(y, axis=1, keepdims=True)        # (Cout, 1) lane reduce
    sq_ref[0, :, :] = jnp.sum(y * y, axis=1, keepdims=True)     # (Cout, 1)


def _apply_kernel(w_ref, xcol_ref, scale_ref, shift_ref, out_ref):
    """Pass 2: recompute the conv tile and apply folded BN: y*scale + shift."""
    y = jnp.dot(w_ref[...], xcol_ref[...], preferred_element_type=jnp.float32)
    out_ref[...] = (y * scale_ref[...] + shift_ref[...]).astype(out_ref.dtype)


def _round_up(a, b):
    return (a + b - 1) // b * b


def linear_cbl_conv(x_nchw, weight, gamma, beta, *, padding=1, block_m=2048,
                    compute_dtype=jnp.bfloat16):
    """Conv2d(bias=False, stride=1, groups=1) + training-mode BatchNorm2d.

    x_nchw: (N, Cin, H, W); weight: (Cout, Cin, KH, KW); gamma/beta: (Cout,).
    Returns NCHW to match the PyTorch module.
    """
    N, Cin, H, W = x_nchw.shape
    Cout, Cin_w, KH, KW = weight.shape
    assert Cin_w == Cin  # TODO(synk): grouped conv (groups > 1) not implemented.
    Ho = H + 2 * padding - KH + 1
    Wo = W + 2 * padding - KW + 1
    M = N * Ho * Wo
    K = Cin * KH * KW

    # ---- im2col, built directly in transposed (K, M) bf16 form -------------
    # TODO(synk): fuse the KH*KW shifted matmuls inside the kernel (reading the
    # padded input once from HBM) to avoid materializing the KH*KW-times larger
    # im2col array; kept wrapper-side here for robustness at small W.
    xb = x_nchw.astype(compute_dtype)
    xp = jnp.pad(xb, ((0, 0), (0, 0), (padding, padding), (padding, padding)))
    patches = jnp.stack(
        [xp[:, :, kh:kh + Ho, kw:kw + Wo] for kh in range(KH) for kw in range(KW)],
        axis=2)                                               # (N, Cin, KH*KW, Ho, Wo)
    xcol_t = patches.transpose(1, 2, 0, 3, 4).reshape(K, M)   # rows ordered (ci, kh, kw)
    w_t = weight.reshape(Cout, K).astype(compute_dtype)       # (Cout, K)

    # ---- lane-dense M tiling (pad M with zero columns) ----------------------
    block_m = max(128, min(_round_up(block_m, 128), _round_up(M, 128)))
    Mp = _round_up(M, block_m)
    if Mp != M:
        xcol_t = jnp.pad(xcol_t, ((0, 0), (0, Mp - M)))
    n_tiles = Mp // block_m

    # VMEM budget: double-buffered inputs + f32 output tile + headroom, capped
    # below v7x's 64 MiB physical VMEM.
    itemsize = jnp.dtype(compute_dtype).itemsize
    vmem_limit = int(min(
        2 * K * block_m * itemsize          # xcol tile (double buffered)
        + 2 * Cout * K * itemsize           # weight tile
        + 2 * Cout * block_m * 4            # f32 output tile
        + (8 << 20),                        # scratch / regalloc headroom
        40 << 20))

    cparams = pltpu.CompilerParams(
        dimension_semantics=("parallel",),  # independent tiles -> megacore on v7x
        vmem_limit_bytes=vmem_limit)

    matmul_flops = 2 * Mp * K * Cout
    xcol_bytes = K * Mp * itemsize
    w_bytes = Cout * K * itemsize

    # ---- pass 1: per-tile channel sums / sums-of-squares --------------------
    stat_spec = pl.BlockSpec((1, Cout, 1), lambda i: (i, 0, 0))
    sums, sqs = pl.pallas_call(
        _stats_kernel,
        out_shape=(jax.ShapeDtypeStruct((n_tiles, Cout, 1), jnp.float32),
                   jax.ShapeDtypeStruct((n_tiles, Cout, 1), jnp.float32)),
        grid=(n_tiles,),
        in_specs=[
            pl.BlockSpec((Cout, K), lambda i: (0, 0)),
            pl.BlockSpec((K, block_m), lambda i: (0, i)),
        ],
        out_specs=(stat_spec, stat_spec),
        compiler_params=cparams,
        cost_estimate=pl.CostEstimate(
            flops=matmul_flops + 3 * Mp * Cout, transcendentals=0,
            bytes_accessed=xcol_bytes + w_bytes + 2 * n_tiles * Cout * 4),
    )(w_t, xcol_t)

    # ---- fold BN into per-channel scale/shift (O(Cout), plain XLA) ----------
    count = jnp.float32(M)                        # zero-padded columns contribute 0
    mean = jnp.sum(sums, axis=0)[:, 0] / count
    var = jnp.sum(sqs, axis=0)[:, 0] / count - mean * mean   # biased var (training BN)
    inv = jax.lax.rsqrt(var + EPS)
    g32 = gamma.astype(jnp.float32)
    scale = (g32 * inv).reshape(Cout, 1)
    shift = (beta.astype(jnp.float32) - mean * g32 * inv).reshape(Cout, 1)
    # TODO(synk): running_mean/running_var update (momentum=0.03) is a training
    # side effect and not part of the forward output; not implemented.

    # ---- pass 2: recompute conv tile, apply y*scale + shift (lane-dense) ----
    out_t = pl.pallas_call(
        _apply_kernel,
        out_shape=jax.ShapeDtypeStruct((Cout, Mp), x_nchw.dtype),
        grid=(n_tiles,),
        in_specs=[
            pl.BlockSpec((Cout, K), lambda i: (0, 0)),
            # If xprof shows exposed DMA at real sizes, add
            # pipeline_mode=pl.Buffered(3) to this streamed spec.
            pl.BlockSpec((K, block_m), lambda i: (0, i)),
            pl.BlockSpec((Cout, 1), lambda i: (0, 0)),
            pl.BlockSpec((Cout, 1), lambda i: (0, 0)),
        ],
        out_specs=pl.BlockSpec((Cout, block_m), lambda i: (0, i)),
        compiler_params=cparams,
        cost_estimate=pl.CostEstimate(
            flops=matmul_flops + 2 * Mp * Cout, transcendentals=0,
            bytes_accessed=xcol_bytes + w_bytes + Cout * Mp * 4),
    )(w_t, xcol_t, scale, shift)

    # (Cout, Mp) -> NCHW (drop M padding).  Callers that can consume the
    # channel-major (Cout, M) layout should skip this transpose (pure HBM BW).
    return out_t[:, :M].reshape(Cout, N, Ho, Wo).transpose(1, 0, 2, 3)


def _reference(x, weight, gamma, beta, padding=1):
    y = jax.lax.conv_general_dilated(
        x, weight, window_strides=(1, 1),
        padding=((padding, padding), (padding, padding)),
        dimension_numbers=("NCHW", "OIHW", "NCHW"),
        precision=jax.lax.Precision.HIGHEST)
    mean = jnp.mean(y, axis=(0, 2, 3), keepdims=True)
    var = jnp.mean((y - mean) ** 2, axis=(0, 2, 3), keepdims=True)
    return (y - mean) * jax.lax.rsqrt(var + EPS) * gamma.reshape(1, -1, 1, 1) \
        + beta.reshape(1, -1, 1, 1)


if __name__ == "__main__":
    key = jax.random.PRNGKey(0)
    k_x, k_w, k_g, k_b = jax.random.split(key, 4)

    # Module config: in_channels=4, out_channels=8, kernel_size=3, padding=1.
    N, Cin, H, W = 2, 4, 16, 16
    Cout, KH, KW = 8, 3, 3

    x = jax.random.normal(k_x, (N, Cin, H, W), dtype=jnp.float32)
    weight = jax.random.normal(k_w, (Cout, Cin, KH, KW), dtype=jnp.float32) * 0.1
    gamma = jax.random.uniform(k_g, (Cout,), dtype=jnp.float32, minval=0.5, maxval=1.5)
    beta = jax.random.normal(k_b, (Cout,), dtype=jnp.float32) * 0.1

    # block_m=128 -> 4-step grid at this size, exercising the tiled two-pass BN.
    out = linear_cbl_conv(x, weight, gamma, beta, padding=1, block_m=128)
    out = jax.block_until_ready(out)

    ref = _reference(x, weight, gamma, beta, padding=1)
    assert out.shape == (N, Cout, H, W)
    # bf16 matmul inputs (f32 accumulation / BN math) -> slightly loose tolerance.
    assert jnp.allclose(out, ref, atol=3e-2, rtol=3e-2), \
        float(jnp.max(jnp.abs(out - ref)))

    print("KERNEL_OK")
</pallas_src>

<mosaic_0001>
module attributes {stable_mosaic.version = 11 : i64} {
  func.func @_stats_kernel(%arg0: i32, %arg1: memref<8x36xbf16, #tpu.memory_space<vmem>>, %arg2: memref<36x128xbf16, #tpu.memory_space<vmem>>, %arg3: memref<1x8x1xf32, #tpu.memory_space<vmem>>, %arg4: memref<1x8x1xf32, #tpu.memory_space<vmem>>) attributes {dimension_semantics = [#tpu.dimension_semantics<parallel>], iteration_bounds = array<i64: 4>, scalar_prefetch = 0 : i64, scratch_operands = 0 : i64, tpu.core_type = #tpu.core_type<tc>, window_params = [{pipeline_mode = #tpu.pipeline_mode<synchronous>, transform_indices = @transform_0, window_bounds = array<i64: 8, 36>}, {transform_indices = @transform_1, window_bounds = array<i64: 36, 128>}, {transform_indices = @transform_2, window_bounds = array<i64: 1, 8, 1>}, {transform_indices = @transform_3, window_bounds = array<i64: 1, 8, 1>}]} {
    %c0 = arith.constant 0 : index
    %c0_0 = arith.constant 0 : index
    %0 = vector.load %arg1[%c0, %c0_0] : memref<8x36xbf16, #tpu.memory_space<vmem>>, vector<8x36xbf16>
    %c0_1 = arith.constant 0 : index
    %c0_2 = arith.constant 0 : index
    %1 = vector.load %arg2[%c0_1, %c0_2] : memref<36x128xbf16, #tpu.memory_space<vmem>>, vector<36x128xbf16>
    %cst = arith.constant dense<0.000000e+00> : vector<8x128xf32>
    %2 = tpu.matmul %0, %1, %cst {dimension_numbers = #tpu.dot_dimension_numbers<[1], [0], [0], [1], [0, 0, 1, 1], [], []>} : vector<8x36xbf16>, vector<36x128xbf16>, vector<8x128xf32> -> vector<8x128xf32>
    %cst_3 = arith.constant dense<0.000000e+00> : vector<8xf32>
    %3 = vector.multi_reduction <add>, %2, %cst_3 [1] : vector<8x128xf32> to vector<8xf32>
    %4 = vector.shape_cast %3 : vector<8xf32> to vector<8x1xf32>
    %c0_4 = arith.constant 0 : index
    %c0_5 = arith.constant 0 : index
    %c0_6 = arith.constant 0 : index
    %5 = vector.load %arg3[%c0_4, %c0_5, %c0_6] : memref<1x8x1xf32, #tpu.memory_space<vmem>>, vector<1x8x1xf32>
    %6 = vector.shape_cast %5 : vector<1x8x1xf32> to vector<8x1xf32>
    %7 = vector.shape_cast %4 : vector<8x1xf32> to vector<1x8x1xf32>
    tpu.vector_store %arg3[%c0_4, %c0_5, %c0_6], %7 {strides = array<i32>} : memref<1x8x1xf32, #tpu.memory_space<vmem>>, vector<1x8x1xf32>,
    %8 = arith.mulf %2, %2 : vector<8x128xf32>
    %cst_7 = arith.constant dense<0.000000e+00> : vector<8xf32>
    %9 = vector.multi_reduction <add>, %8, %cst_7 [1] : vector<8x128xf32> to vector<8xf32>
    %10 = vector.shape_cast %9 : vector<8xf32> to vector<8x1xf32>
    %c0_8 = arith.constant 0 : index
    %c0_9 = arith.constant 0 : index
    %c0_10 = arith.constant 0 : index
    %11 = vector.load %arg4[%c0_8, %c0_9, %c0_10] : memref<1x8x1xf32, #tpu.memory_space<vmem>>, vector<1x8x1xf32>
    %12 = vector.shape_cast %11 : vector<1x8x1xf32> to vector<8x1xf32>
    %13 = vector.shape_cast %10 : vector<8x1xf32> to vector<1x8x1xf32>
    tpu.vector_store %arg4[%c0_8, %c0_9, %c0_10], %13 {strides = array<i32>} : memref<1x8x1xf32, #tpu.memory_space<vmem>>, vector<1x8x1xf32>,
    return
  }
  func.func @transform_0(%arg0: i32) -> (i32, i32) {
    %c0_i32 = arith.constant 0 : i32
    %c0_i32_0 = arith.constant 0 : i32
    %c0_i32_1 = arith.constant 0 : i32
    return %c0_i32, %c0_i32_0 : i32, i32
  }
  func.func @transform_1(%arg0: i32) -> (i32, i32) {
    %c0_i32 = arith.constant 0 : i32
    %c0_i32_0 = arith.constant 0 : i32
    return %c0_i32, %arg0 : i32, i32
  }
  func.func @transform_2(%arg0: i32) -> (i32, i32, i32) {
    %c0_i32 = arith.constant 0 : i32
    %c0_i32_0 = arith.constant 0 : i32
    %c0_i32_1 = arith.constant 0 : i32
    return %arg0, %c0_i32, %c0_i32_0 : i32, i32, i32
  }
  func.func @transform_3(%arg0: i32) -> (i32, i32, i32) {
    %c0_i32 = arith.constant 0 : i32
    %c0_i32_0 = arith.constant 0 : i32
    %c0_i32_1 = arith.constant 0 : i32
    return %arg0, %c0_i32, %c0_i32_0 : i32, i32, i32
  }
}

</mosaic_0001>

<bundles_post_ra>
// kernel: tpu_custom_call.1
= control target key start
LH: loop header
LB: loop body
LE: loop exit
PB: predicated region body
PF: predicated region fallthrough
CT: control target
= control target key end

     0   :  { %9 = vsyncpa [#allocation3], 0  ;;  %s743_s0 = inlined_call_operand.hbm [shape: bf16[8,36], index: 0, kind: input, shape index: {}]   ;;  %s744_s1 = inlined_call_operand.hbm [shape: bf16[36,512], index: 1, kind: input, shape index: {}]   ;;  %s745_s2 = inlined_call_operand.vmem [shape: f32[4,8,1], index: 2, kind: output, shape index: {0}]   ;;  %s746_s3 = inlined_call_operand.vmem [shape: f32[4,8,1], index: 3, kind: output, shape index: {1}]  }
   0x1   :  { %10 = vsyncpa [#allocation5], 0 }
   0x2   :  { %12 = vsyncpa [#allocation5 + $0x1], 0  ;;  %s608_s12 = smov 0   ;;  %s610_s13 = smov 0  }
   0x3   :  { %s612_s14 = smov 0   ;;  %s614_s15 = smov 0  }
   0x4 LB: > { %s627_s16 = sadd.s32 4294967295, %s579_s15   ;;  %s630_s17 = sadd.s32 1, %s579_s15   ;;  %s579_s15 = sphi %s614_s15, %s762_s15   ;;  %s575_s14 = sphi %s612_s14, %s761_s14   ;;  %s571_s13 = sphi %s610_s13, %s760_s13   ;;  %s567_s12 = sphi %s608_s12, %s759_s12  }
   0x5   : > { %s43_s18 = ssub.s32 %s579_s15, %s630_s17  ;;  %s46_s19 = sadd.s32 1, %s575_s14 }
   0x6   : > { %p44_p0 = scmp.eq.s32.totalorder %s43_s18, 0  ;;  %p53_p1 = scmp.ne.s32.totalorder %s575_s14, %s571_s13 }
   0x7   : > { %p54_p2 = scmp.eq.s32.totalorder %s579_s15, 0  ;;  %p59_p3 = scmp.ne.s32.totalorder %s571_s13, %s567_s12 }
   0x8   : > { %s640_s20 = scalar_select %p44_p0, %s575_s14, %s46_s19  }
   0x9   : > { %p642_p4 = por %p54_p2, %p53_p1  ;;  %p747_p5 = scmp.eq.s32.totalorder %s627_s16, 0 }
   0xa   : > { %p399_p6 = scmp.ge.s32.totalorder %s579_s15, 1  ;;  %p122_p7 = scmp.lt.s32.totalorder %s579_s15, 5 }
   0xb   : > { %p651_p8 = por %p747_p5, %p59_p3  ;;  %s581_s24 = smov [#allocation2]  }
   0xc   : > { %p655_p9 = pnand %p399_p6, %p122_p7  ;;  %s135_s25 = sshll.u32 %s581_s24, 4  ;;  %s136_s25 = int_to_ptr.vmem [resolvable:$true] %s135_s25 }
   0xd   : > { %s751_s22 = scalar_select %p651_p8, 1, 0 }
   0xe   : > { %s752_s23 = scalar_select %p655_p9, 1, 0 }
   0xf   : > { %p435_p10 = pneg %p655_p9  ;;  %p444_p11 = scmp.lt.s32.totalorder %s579_s15, 4 }
  0x10   : > { %s146_s26 = sand.u32 1, %s575_s14   ;;  %s402_s30 = sshll.u32 %s579_s15, 6 }
  0x11   : > { %p665_p12 = pnand %p435_p10, %p747_p5  ;;  %p671_p13 = pnand %p444_p11, %p642_p4 }
  0x12   : > { %s427_s29 = smul.u32 20, %s146_s26  ;;  %s498_s4 = scalar_lea.vmem %s136_s25, 64 }
  0x13   : > { %p489_p0 = pneg %p665_p12  ;;  %p499_p1 = scmp.ne.s32.totalorder %s136_s25, %s498_s4 }
  0x14   : > { %p506_p6 = scmp.lt.s32.totalorder %s136_s25, %s136_s25  ;;  %p507_p7 = scmp.lt.s32.totalorder %s498_s4, %s498_s4 }
  0x15   : > { %p501_p2 = pnand %p499_p1, %p489_p0 }
  0x16   : > { %p508_p10 = por %p507_p7, %p506_p6 }
  0x17   : > { %p502_p3 = pneg %p501_p2 }
  0x19   : > { %p509_p5 = pnand %p508_p10, %p502_p3 }
  0x1b   : > { %512 = shalt.err (!%p509_p5)
}
  0x1c   : > { %438 = dma.hbm_to_vmem [thread:$0]  (!%p665_p12), %s743_s0, 64, %s136_s25, [#allocation3]  }
  0x1d   : > { %s686_s9 = scalar_lea.hbm %s744_s1, %s402_s30  ;;  %s150_s10 = scalar_lea.vmem [#allocation4], %s427_s29 }
  0x1e   : > { %s156_s11 = sshll.u32 %s150_s10, 4  ;;  %s690_s12 = scalar_lea.sflag [#allocation5], %s146_s26  ;;  %s688_s11 = int_to_ptr.vmem [resolvable:$true] %s156_s11 }
  0x1f   : > { %s513_s15 = scalar_lea.hbm %s686_s9, 320  ;;  %p515_p5 = pneg %p671_p13 }
  0x20   : > { %p514_p4 = scmp.ne.s32.totalorder %s686_s9, %s513_s15  ;;  %s518_s21 = scalar_lea.hbm %s744_s1, 1280 }
  0x21   : > { %p519_p0 = scmp.lt.s32.totalorder %s686_s9, %s744_s1  ;;  %p520_p1 = scmp.lt.s32.totalorder %s518_s21, %s513_s15 }
  0x22   : > { %p516_p11 = pnand %p515_p5, %p514_p4 }
  0x23   : > { %p521_p2 = por %p520_p1, %p519_p0 }
  0x24   : > { %p517_p12 = pneg %p516_p11 }
  0x26   : > { %p522_p3 = pnand %p521_p2, %p517_p12 }
  0x28   : > { %525 = shalt.err (!%p522_p3)
}
  0x29   : > { %s526_s26 = scalar_lea.vmem %s688_s11, 320  ;;  %s582_s27 = smov [#allocation4]  }
  0x2a   : > { %p527_p6 = scmp.ne.s32.totalorder %s688_s11, %s526_s26  ;;  %s531_s29 = sshll.u32 %s582_s27, 4  ;;  %s532_s29 = int_to_ptr.vmem [resolvable:$false] %s531_s29 }
  0x2b   : > { %s533_s30 = scalar_lea.vmem %s532_s29, 640  ;;  %p534_p4 = scmp.lt.s32.totalorder %s688_s11, %s532_s29 }
  0x2c   : > { %p529_p7 = pnand %p527_p6, %p515_p5  ;;  %p535_p11 = scmp.lt.s32.totalorder %s533_s30, %s526_s26 }
  0x2e   : > { %p530_p10 = pneg %p529_p7  ;;  %p536_p8 = por %p535_p11, %p534_p4 }
  0x30   : > { %p537_p9 = pnand %p536_p8, %p530_p10 }
  0x32   : > { %540 = shalt.err (!%p537_p9)
}
  0x33   : > { %s583_s4 = smov 256   ;;  %s584_s5 = smov 64  }
  0x34   : > { %s585_s6 = smov 4   ;;  %p755_p5 = scmp.ne.s32.totalorder %s752_s23, 0 }
  0x35   : > { %442 = dma.hbm_to_vmem [thread:$0]  (!%p671_p13), %s686_s9, 320, %s688_s11, %s690_s12, %s583_s4, %s584_s5, %s585_s6  }
  0x36   : > { %168 = sbr.rel (%p755_p5) target bundleno = 415 (0x19f), region = 28  ;;  %p756_p12 = scmp.eq.s32.totalorder (!%p755_p5), %s627_s16, 0 }
  0x3b   : > { %558 = dma.done.wait (%p756_p12), [#allocation3], 64   ;;  %p757_p0 = pmov %p756_p12 }
  0x3c   : > { %s174_s7 = sand.u32 1, %s571_s13   ;;  %p758_p8 = scmp.ne.s32.totalorder %s751_s22, 0 }
  0x3d   : > { %560 = vsyncadd (%p757_p0), [#allocation3], 4294967232  ;;  %s428_s8 = smul.u32 20, %s174_s7  ;;  %s175_s10 = scalar_lea.sflag [#allocation5], %s174_s7 }
  0x3f   : > { %s178_s15 = scalar_lea.vmem [#allocation4], %s428_s8 }
  0x40   : > { %562 = dma.done.wait (%p758_p8), %s175_s10, 320  }
  0x41   : > { %564 = vsyncadd (%p758_p8), %s175_s10, 4294966976  ;;  %v586_v0 = vmov 0.0   ;;  %vm587_vm0 = vmmov 0   ;;  %vm238_vm1 = vcmask 1041408   ;;  %v485_v3 = vld [vmem:[%s178_s15 + $0x8] sm:$0xff]   ;;  %v486_v4 = vld [vmem:[%s178_s15] sm:$0xff]  }
  0x42   : > { %417 = vmatprep.subr.bf16.mxu0 %v586_v0  ;;  %423 = vmatprep.mubr.msk.bf16.mxu0 %vm587_vm0, %v586_v0  ;;  %v484_v1 = vld [vmem:[%s178_s15 + $0x10] ss:$0 sps:$4 sm:$0x33]   ;;  %v213_v5 = vld [vmem:[#allocation2] sm:$0xf]  ;;  %vm234_vm2 = vcmask 293888  }
  0x43   : > { %v240_v2 = vsel %vm238_vm1, %v484_v1, 0  ;;  %p204_p9 = scmp.lt.s32.totalorder %s627_s16, 3  ;;  %vm284_vm3 = vcmask 7168  }
  0x44   : > { %418 = vmatpush3.bf16.msra.mxu0 %v240_v2 }
  0x45   : > { %419 = vmatprep.subr.bf16.mxu0 %v586_v0  ;;  %s764_s16 = smov (!%p204_p9, %s627_s16), 3 }
  0x46   : > { %s405_s22 = sshll.u32 %s764_s16, 3 }
  0x47   : > { %s207_s9 = scalar_lea.vmem %s745_s2, %s405_s22  ;;  %s211_s18 = scalar_lea.vmem %s746_s3, %s405_s22 }
  0x48   : > { %420 = vmatpush3.bf16.msra.mxu0 %v485_v3 }
  0x49   : > { %421 = vmatprep.subr.bf16.mxu0 %v586_v0 }
  0x4c   : > { %422 = vmatpush3.bf16.msra.mxu0 %v486_v4 }
  0x4f   : > { %424 = vmatmul.mubr.msk.bf16.vlgmr.msra.gmra.mxu0 %vm234_vm2, %v213_v5 }
 0x10f   : > { %v276_v6 = vpop.f32.mrf.mxu0 }
 0x110   : > { %282 = vadd.xlane.f32.xlu0 %v276_v6  ;;  %v286_v8 = vmul.f32 %v276_v6, %v276_v6 }
 0x111   : > { %v425_v7 = vpop.f32.mrf.mxu0 }
 0x113   : > { %v279_v9 = vpop.f32.mrf.mxu0 }
 0x114   : > { %287 = vadd.xlane.f32.xlu0 %v286_v8 }
 0x115   : > { %v426_v10 = vpop.f32.mrf.mxu0 }
 0x199   : > { %v283_v11 = vpop.xlane.xlu0 %282 }
 0x19a   : > { %285 = vst.msk [vmem:[%s207_s9] sm:$0xff] %vm284_vm3, %v283_v11 }
 0x19d   : > { %v288_v12 = vpop.xlane.xlu0 %287 }
 0x19e   : > { %289 = vst.msk [vmem:[%s211_s18] sm:$0xff] %vm284_vm3, %v288_v12 }
 0x19f PF: > { %p15_p13 = scmp.ge.s32.totalorder %s630_s17, 6   ;;  %s759_s12 = smov %s571_s13 }
 0x1a0   : > { %s760_s13 = smov %s575_s14  ;;  %s761_s14 = smov %s640_s20 }
 0x1a1   : > { %s762_s15 = smov %s630_s17  ;;  %17 = sbr.rel (!%p15_p13) target bundleno = 4 (0x4), region = 85 }
 0x1a6   :  { %323 = vsyncpa [#allocation3], 1 }
 0x1a7   :  { %325 = vsyncpa [#allocation3 + $0x1], 1 }
 0x1a8   :  { %326 = vsyncpa [#allocation5], 1 }
 0x1a9   :  { %328 = vsyncpa [#allocation5 + $0x1], 1 }

</bundles_post_ra>
